<compile_context>
chip_gen: v7x
topology: tpu7x:2x2x1
jax: 0.10.0
libtpu: 0.0.40
codegen_flags: <defaults>
</compile_context>

<pallas_src>
import numpy as np
import jax
import jax.numpy as jnp
from jax import lax
from jax.experimental import pallas as pl
from jax.experimental.pallas import tpu as pltpu


# ----------------------------------------------------------------------------
# Pallas kernel: grouped, tiled (tm, Kg) x (Kg, Npad) GEMM + bias.
# A/B arrive in bf16; accumulation is f32 on the MXU; output tile is lane-dense.
# ----------------------------------------------------------------------------
def _grouped_matmul_bias_kernel(a_ref, b_ref, bias_ref, o_ref):
    # a_ref:    (1, tm, Kg)   bf16  (cols rows for this M tile / group)
    # b_ref:    (1, Kg, Npad) bf16  (group weights, Cout zero-padded to 128k lanes)
    # bias_ref: (1, 1, Npad)  f32
    # o_ref:    (1, tm, Npad) f32
    acc = jnp.dot(a_ref[0], b_ref[0], preferred_element_type=jnp.float32)
    o_ref[0] = acc + bias_ref[0]


def _round_up(v, m):
    return (v + m - 1) // m * m


def _pick_tm(M, tm_max=512):
    # >= 2 M tiles when possible (v7x has 2 TCs), rows a multiple of 8, <= tm_max.
    half = pl.cdiv(M, 2)
    return max(8, min(tm_max, _round_up(half, 8)))


def grouped_matmul_bias(cols_g, w_g, bias_g, *, tm=None):
    """cols_g: (g, M, Kg) bf16, w_g: (g, Kg, Npad) bf16, bias_g: (g, 1, Npad) f32
    -> (g, M, Npad) f32."""
    g, M, Kg = cols_g.shape
    _, _, Npad = w_g.shape
    if tm is None:
        tm = _pick_tm(M)
    n_mt = pl.cdiv(M, tm)
    return pl.pallas_call(
        _grouped_matmul_bias_kernel,
        out_shape=jax.ShapeDtypeStruct((g, M, Npad), jnp.float32),
        grid_spec=pltpu.PrefetchScalarGridSpec(
            num_scalar_prefetch=0,
            grid=(n_mt, g),
            in_specs=[
                pl.BlockSpec((1, tm, Kg), lambda mi, gi: (gi, mi, 0)),    # A rows
                pl.BlockSpec((1, Kg, Npad), lambda mi, gi: (gi, 0, 0)),   # group W
                pl.BlockSpec((1, 1, Npad), lambda mi, gi: (gi, 0, 0)),    # group bias
            ],
            out_specs=pl.BlockSpec((1, tm, Npad), lambda mi, gi: (gi, mi, 0)),
        ),
        compiler_params=pltpu.CompilerParams(
            dimension_semantics=("parallel", "parallel"),
            vmem_limit_bytes=32 * 1024 * 1024,
        ),
    )(cols_g, w_g, bias_g)


# ----------------------------------------------------------------------------
# Plain-JAX glue.
# ----------------------------------------------------------------------------
def _out_size(size, k, s, p, d):
    return (size + 2 * p - d * (k - 1) - 1) // s + 1


def conv2d_nchw(x, weight, bias, stride, pad, dil):
    """Offset head: XLA native conv (better than im2col+GEMM for ~18 out lanes)."""
    out = lax.conv_general_dilated(
        x, weight,
        window_strides=stride,
        padding=[(pad[0], pad[0]), (pad[1], pad[1])],
        rhs_dilation=dil,
        dimension_numbers=("NCHW", "OIHW", "NCHW"),
    )
    return out + bias[None, :, None, None]


def deform_im2col(x, offsets, kh, kw, stride, pad, dil, offset_g):
    """Torchvision deform_conv2d (v1) bilinear sampling -> (B*Hout*Wout, C*kh*kw) f32."""
    B, C, H, W = x.shape
    _, _, Hout, Wout = offsets.shape
    Cg = C // offset_g
    off = offsets.reshape(B, offset_g, kh, kw, 2, Hout, Wout)
    dy = off[:, :, :, :, 0]  # (B, og, kh, kw, Hout, Wout)
    dx = off[:, :, :, :, 1]

    base_y = (
        (jnp.arange(Hout, dtype=jnp.float32) * stride[0] - pad[0])[None, None, None, None, :, None]
        + (jnp.arange(kh, dtype=jnp.float32) * dil[0])[None, None, :, None, None, None]
    )
    base_x = (
        (jnp.arange(Wout, dtype=jnp.float32) * stride[1] - pad[1])[None, None, None, None, None, :]
        + (jnp.arange(kw, dtype=jnp.float32) * dil[1])[None, None, None, :, None, None]
    )
    py = base_y + dy
    px = base_x + dx

    valid = (py > -1.0) & (py < H) & (px > -1.0) & (px < W)
    y0 = jnp.floor(py)
    x0 = jnp.floor(px)
    ly = py - y0
    lx = px - x0
    hy = 1.0 - ly
    hx = 1.0 - lx
    y0i = y0.astype(jnp.int32)
    x0i = x0.astype(jnp.int32)
    y1i = y0i + 1
    x1i = x0i + 1

    x_g = x.reshape(B, offset_g, Cg, H * W)

    def gather(yi, xi):
        yc = jnp.clip(yi, 0, H - 1)
        xc = jnp.clip(xi, 0, W - 1)
        idx = yc * W + xc  # (B, og, kh, kw, Hout, Wout)

        def per(xf, ix):  # xf: (Cg, H*W), ix: (kh, kw, Hout, Wout)
            return jnp.take(xf, ix, axis=-1)  # (Cg, kh, kw, Hout, Wout)

        return jax.vmap(jax.vmap(per))(x_g, idx)  # (B, og, Cg, kh, kw, Hout, Wout)

    m1 = ((y0i >= 0) & (x0i >= 0)).astype(x.dtype)
    m2 = ((y0i >= 0) & (x1i <= W - 1)).astype(x.dtype)
    m3 = ((y1i <= H - 1) & (x0i >= 0)).astype(x.dtype)
    m4 = ((y1i <= H - 1) & (x1i <= W - 1)).astype(x.dtype)
    vmask = valid.astype(x.dtype)

    w1 = hy * hx * m1 * vmask
    w2 = hy * lx * m2 * vmask
    w3 = ly * hx * m3 * vmask
    w4 = ly * lx * m4 * vmask

    v1 = gather(y0i, x0i)
    v2 = gather(y0i, x1i)
    v3 = gather(y1i, x0i)
    v4 = gather(y1i, x1i)

    def ex(w):  # insert channel axis for broadcasting
        return w[:, :, None]

    val = ex(w1) * v1 + ex(w2) * v2 + ex(w3) * v3 + ex(w4) * v4
    # (B, og, Cg, kh, kw, Hout, Wout) -> (B, Hout, Wout, C, kh, kw) -> (M, C*kh*kw)
    val = val.transpose(0, 5, 6, 1, 2, 3, 4).reshape(B * Hout * Wout, C * kh * kw)
    return val


# ----------------------------------------------------------------------------
# Forward passes.
# ----------------------------------------------------------------------------
def deform_conv2d_forward(x, offsets, weight, bias, stride, pad, dil, g, offset_g):
    B, C, H, W = x.shape
    C2, _, kh, kw = weight.shape
    _, _, Hout, Wout = offsets.shape
    M = B * Hout * Wout
    Cin_g = C // g
    Cout_g = C2 // g
    Kg = Cin_g * kh * kw
    Npad = max(128, _round_up(Cout_g, 128))  # lane-dense output tiles

    cols = deform_im2col(x, offsets, kh, kw, stride, pad, dil, offset_g)  # (M, C*kh*kw) f32
    # Group-sliced, bf16 cols: the dominant HBM intermediate at half size.
    cols_g = cols.reshape(M, g, Kg).transpose(1, 0, 2).astype(jnp.bfloat16)  # (g, M, Kg)

    # Weights -> (g, Kg, Npad) bf16, zero-padded along the lane (Cout) dim.
    w = weight.reshape(g, Cout_g, Kg).transpose(0, 2, 1)                     # (g, Kg, Cout_g)
    w = jnp.pad(w, ((0, 0), (0, 0), (0, Npad - Cout_g))).astype(jnp.bfloat16)
    b = jnp.pad(bias.reshape(g, 1, Cout_g),
                ((0, 0), (0, 0), (0, Npad - Cout_g))).astype(jnp.float32)

    out = grouped_matmul_bias(cols_g, w, b)                                  # (g, M, Npad) f32
    out = out.transpose(1, 0, 2)[:, :, :Cout_g].reshape(M, C2)
    return out.reshape(B, Hout, Wout, C2).transpose(0, 3, 1, 2)


def deform_conv_v1_forward(x, w_off, b_off, w_def, b_def, stride, pad, dil, g, offset_g):
    """== DeformConvV1.forward: deform_conv(x, offset_conv(x))."""
    offsets = conv2d_nchw(x, w_off, b_off, stride, pad, dil)
    return deform_conv2d_forward(x, offsets, w_def, b_def, stride, pad, dil, g, offset_g)


# ----------------------------------------------------------------------------
if __name__ == "__main__":
    key = jax.random.PRNGKey(0)
    B, C1, H, W = 2, 4, 16, 16
    C2, k, s, p, d, g, offset_g = 8, 3, 1, 1, 1, 1, 1
    kh = kw = k

    k1, k2, k3, k4 = jax.random.split(key, 4)
    x = jax.random.normal(k1, (B, C1, H, W), jnp.float32)

    # offset_conv: weight is zero-initialized per DeformConvV1.__init_weights;
    # bias keeps a (deterministic) random init, so offsets are nonzero constants.
    off_c2 = 2 * kh * kw * offset_g
    w_off = jnp.zeros((off_c2, C1, kh, kw), jnp.float32)
    b_off = 0.5 * jax.random.normal(k2, (off_c2,), jnp.float32)

    # deform_conv parameters (synthetic deterministic init).
    w_def = 0.1 * jax.random.normal(k3, (C2, C1 // g, kh, kw), jnp.float32)
    b_def = 0.1 * jax.random.normal(k4, (C2,), jnp.float32)

    out = deform_conv_v1_forward(
        x, w_off, b_off, w_def, b_def, (s, s), (p, p), (d, d), g, offset_g
    )
    out = jax.block_until_ready(out)

    Hout = _out_size(H, kh, s, p, d)
    Wout = _out_size(W, kw, s, p, d)

    # Sanity check against an f32 numpy reference of the same math (bf16 GEMM in
    # the kernel -> loosened tolerance).
    offsets_ref = conv2d_nchw(x, w_off, b_off, (s, s), (p, p), (d, d))
    cols_ref = deform_im2col(x, offsets_ref, kh, kw, (s, s), (p, p), (d, d), offset_g)
    ref = (np.asarray(cols_ref) @ np.asarray(w_def.reshape(C2, -1)).T
           + np.asarray(b_def)).reshape(B, Hout, Wout, C2).transpose(0, 3, 1, 2)

    assert out.shape == (B, C2, Hout, Wout)
    assert bool(jnp.all(jnp.isfinite(out)))
    assert np.allclose(np.asarray(out), ref, atol=5e-2, rtol=5e-2)
    print("KERNEL_OK")
</pallas_src>

<mosaic_0001>
module attributes {stable_mosaic.version = 11 : i64} {
  func.func @_grouped_matmul_bias_kernel(%arg0: i32, %arg1: i32, %arg2: memref<1x256x36xbf16, #tpu.memory_space<vmem>>, %arg3: memref<1x36x128xbf16, #tpu.memory_space<vmem>>, %arg4: memref<1x1x128xf32, #tpu.memory_space<vmem>>, %arg5: memref<1x256x128xf32, #tpu.memory_space<vmem>>) attributes {dimension_semantics = [#tpu.dimension_semantics<parallel>, #tpu.dimension_semantics<parallel>], iteration_bounds = array<i64: 2, 1>, scalar_prefetch = 0 : i64, scratch_operands = 0 : i64, tpu.core_type = #tpu.core_type<tc>, window_params = [{transform_indices = @transform_0, window_bounds = array<i64: 1, 256, 36>}, {transform_indices = @transform_1, window_bounds = array<i64: 1, 36, 128>}, {transform_indices = @transform_2, window_bounds = array<i64: 1, 1, 128>}, {transform_indices = @transform_3, window_bounds = array<i64: 1, 256, 128>}]} {
    %c0 = arith.constant 0 : index
    %c0_0 = arith.constant 0 : index
    %c0_1 = arith.constant 0 : index
    %0 = vector.load %arg2[%c0, %c0_0, %c0_1] : memref<1x256x36xbf16, #tpu.memory_space<vmem>>, vector<1x256x36xbf16>
    %1 = vector.shape_cast %0 : vector<1x256x36xbf16> to vector<256x36xbf16>
    %c0_2 = arith.constant 0 : index
    %c0_3 = arith.constant 0 : index
    %c0_4 = arith.constant 0 : index
    %2 = vector.load %arg3[%c0_2, %c0_3, %c0_4] : memref<1x36x128xbf16, #tpu.memory_space<vmem>>, vector<1x36x128xbf16>
    %3 = vector.shape_cast %2 : vector<1x36x128xbf16> to vector<36x128xbf16>
    %cst = arith.constant dense<0.000000e+00> : vector<256x128xf32>
    %4 = tpu.matmul %1, %3, %cst {dimension_numbers = #tpu.dot_dimension_numbers<[1], [0], [0], [1], [0, 0, 1, 1], [], []>} : vector<256x36xbf16>, vector<36x128xbf16>, vector<256x128xf32> -> vector<256x128xf32>
    %c0_5 = arith.constant 0 : index
    %c0_6 = arith.constant 0 : index
    %c0_7 = arith.constant 0 : index
    %5 = vector.load %arg4[%c0_5, %c0_6, %c0_7] : memref<1x1x128xf32, #tpu.memory_space<vmem>>, vector<1x1x128xf32>
    %6 = vector.shape_cast %5 : vector<1x1x128xf32> to vector<1x128xf32>
    %7 = vector.broadcast %6 : vector<1x128xf32> to vector<256x128xf32>
    %8 = arith.addf %4, %7 : vector<256x128xf32>
    %c0_8 = arith.constant 0 : index
    %c0_9 = arith.constant 0 : index
    %c0_10 = arith.constant 0 : index
    %9 = vector.load %arg5[%c0_8, %c0_9, %c0_10] : memref<1x256x128xf32, #tpu.memory_space<vmem>>, vector<1x256x128xf32>
    %10 = vector.shape_cast %9 : vector<1x256x128xf32> to vector<256x128xf32>
    %11 = vector.shape_cast %8 : vector<256x128xf32> to vector<1x256x128xf32>
    tpu.vector_store %arg5[%c0_8, %c0_9, %c0_10], %11 {strides = array<i32>} : memref<1x256x128xf32, #tpu.memory_space<vmem>>, vector<1x256x128xf32>,
    return
  }
  func.func @transform_0(%arg0: i32, %arg1: i32) -> (i32, i32, i32) {
    %c0_i32 = arith.constant 0 : i32
    %c0_i32_0 = arith.constant 0 : i32
    return %arg1, %arg0, %c0_i32 : i32, i32, i32
  }
  func.func @transform_1(%arg0: i32, %arg1: i32) -> (i32, i32, i32) {
    %c0_i32 = arith.constant 0 : i32
    %c0_i32_0 = arith.constant 0 : i32
    %c0_i32_1 = arith.constant 0 : i32
    return %arg1, %c0_i32, %c0_i32_0 : i32, i32, i32
  }
  func.func @transform_2(%arg0: i32, %arg1: i32) -> (i32, i32, i32) {
    %c0_i32 = arith.constant 0 : i32
    %c0_i32_0 = arith.constant 0 : i32
    %c0_i32_1 = arith.constant 0 : i32
    return %arg1, %c0_i32, %c0_i32_0 : i32, i32, i32
  }
  func.func @transform_3(%arg0: i32, %arg1: i32) -> (i32, i32, i32) {
    %c0_i32 = arith.constant 0 : i32
    %c0_i32_0 = arith.constant 0 : i32
    return %arg1, %arg0, %c0_i32 : i32, i32, i32
  }
}

</mosaic_0001>

<bundles_post_ra>
// kernel: tpu_custom_call.1
= control target key start
LH: loop header
LB: loop body
LE: loop exit
PB: predicated region body
PF: predicated region fallthrough
CT: control target
= control target key end

     0   :  { %8 = vsyncpa [#allocation3], 0  ;;  %s1271_s0 = inlined_call_operand.vmem [shape: bf16[1,512,36], index: 0, kind: input, shape index: {}]   ;;  %s1272_s1 = inlined_call_operand.vmem [shape: bf16[1,36,128], index: 1, kind: input, shape index: {}]   ;;  %s1273_s2 = inlined_call_operand.vmem [shape: f32[1,1,128], index: 2, kind: input, shape index: {}]   ;;  %s1274_s3 = inlined_call_operand.hbm [shape: f32[1,512,128], index: 3, kind: output, shape index: {}]  }
   0x1   :  { %10 = vsyncpa [#allocation3 + $0x1], 0  ;;  %s1038_s12 = smov 0   ;;  %s1040_s13 = smov 0  }
   0x2   :  { %s1042_s14 = smov 0   ;;  %s1044_s15 = smov 0  }
   0x3   :  { %s1046_s16 = smov 0   ;;  %s1048_s17 = smov 0  }
   0x4 LB: > { %s742_s18 = sadd.s32 4294967295, %s1013_s17   ;;  %s743_s19 = sadd.s32 4294967294, %s1013_s17   ;;  %s1013_s17 = sphi %s1048_s17, %s16_s17   ;;  %s1009_s16 = sphi %s1046_s16, %s1281_s16   ;;  %s1005_s15 = sphi %s1044_s15, %s1280_s15   ;;  %s1001_s14 = sphi %s1042_s14, %s1279_s14   ;;  %s997_s13 = sphi %s1040_s13, %s1278_s13   ;;  %s993_s12 = sphi %s1038_s12, %s1277_s12  }
   0x5   : > { %s28_s20 = sadd.s32 1, %s1009_s16  ;;  %s117_s21 = sadd.s32 1, %s1001_s14 }
   0x6   : > { %p30_p0 = scmp.ge.s32.totalorder %s28_s20, 2  ;;  %p127_p1 = scmp.ne.s32.totalorder %s1001_s14, %s997_s13 }
   0x7   : > { %p128_p2 = scmp.eq.s32.totalorder %s742_s18, 1  ;;  %p133_p3 = scmp.ne.s32.totalorder %s997_s13, %s993_s12 }
   0x8   : > { %s1283_s20 = smov (%p30_p0, %s28_s20), 0  ;;  %p134_p5 = scmp.eq.s32.totalorder %s743_s19, 1 }
   0x9   : > { %p1078_p4 = por %p128_p2, %p127_p1  ;;  %s113_s23 = ssub.s32 %s1009_s16, %s1283_s20 }
   0xa   : > { %p748_p6 = scmp.ge.s32.totalorder %s1013_s17, 1  ;;  %p115_p7 = scmp.eq.s32.totalorder %s113_s23, 0 }
   0xb   : > { %p1085_p8 = por %p134_p5, %p133_p3  ;;  %p179_p9 = scmp.lt.s32.totalorder %s1013_s17, 3 }
   0xc   : > { %s1091_s25 = scalar_select %p115_p7, %s1001_s14, %s117_s21  }
   0xd   : > { %p180_p10 = pnand %p748_p6, %p179_p9 }
   0xe   : > { %v916_v0 = vld [vmem:[%s1272_s1] sm:$0xff] (!%p180_p10)   ;;  %v917_v1 = vld [vmem:[%s1272_s1 + $0x8] sm:$0xff] (!%p180_p10)   ;;  %s750_s30 = sshll.u32 (!%p180_p10), %s1005_s15, 5  ;;  %v918_v2 = vld [vmem:[%s1272_s1 + $0x10] ss:$0 sps:$4 sm:$0x33] (!%p180_p10)  }
   0xf   : > { %183 = sbr.rel (%p180_p10) target bundleno = 284 (0x11c), region = 32  ;;  %813 = vmatprep.subr.bf16.mxu0 (!%p180_p10), %v916_v0  ;;  %851 = vmatprep.subr.bf16.mxu1 (!%p180_p10), %v916_v0  ;;  %p218_p11 = scmp.lt.s32.totalorder (!%p180_p10), %s750_s30, 63  ;;  %vm423_vm0 = vcmask (!%p180_p10), 1041408   ;;  %vm374_vm1 = vcmask (!%p180_p10), 293888   ;;  %v1146_v20 = vld [vmem:[%s1273_s2] ss:$0 sm:$0xff] (!%p180_p10) }
  0x10   : > { %814 = vmatpush3.bf16.msra.mxu0 (!%p180_p10), %v916_v0  ;;  %854 = vmatpush3.bf16.msra.mxu1 (!%p180_p10), %v916_v0  ;;  %v425_v3 = vsel (!%p180_p10), %vm423_vm0, %v918_v2, 0  ;;  %s212_s10 = sand.u32 (!%p180_p10), 1, %s997_s13   ;;  %s793_s23 = sshll.u32 (!%p180_p10), %s1005_s15, 12 }
  0x11   : > { %815 = vmatprep.subr.bf16.mxu0 (!%p180_p10), %v917_v1  ;;  %852 = vmatprep.subr.bf16.mxu1 (!%p180_p10), %v917_v1  ;;  %s749_s11 = sshll.u32 (!%p180_p10), %s212_s10, 8  ;;  %s1211_s28 = scalar_lea.hbm (!%p180_p10), %s1274_s3, %s793_s23 }
  0x12   : > { %s1152_s21 = scalar_lea.vmem (!%p180_p10), [#allocation2], %s749_s11  ;;  %s1225_s29 = scalar_lea.sflag (!%p180_p10), [#allocation3], %s212_s10 }
  0x13   : > { %s636_s26 = sshll.u32 (!%p180_p10), %s1152_s21, 4  ;;  %s1015_s4 = smov (!%p180_p10), [#allocation2]   ;;  %s1213_s26 = int_to_ptr.vmem [resolvable:$true] %s636_s26 }
  0x14   : > { %816 = vmatpush3.bf16.msra.mxu0 (!%p180_p10), %v917_v1  ;;  %855 = vmatpush3.bf16.msra.mxu1 (!%p180_p10), %v917_v1  ;;  %s939_s5 = sshll.u32 (!%p180_p10), %s1015_s4, 4  ;;  %s940_s5 = int_to_ptr.vmem [resolvable:$false] %s939_s5 }
  0x15   : > { %857 = vmatprep.subr.msk.bf16.mxu0 (!%p180_p10), %vm423_vm0, %v918_v2  ;;  %858 = vmatprep.subr.msk.bf16.mxu1 (!%p180_p10), %vm423_vm0, %v918_v2  ;;  %p942_p1 = scmp.lt.s32.totalorder (!%p180_p10), %s1213_s26, %s940_s5 }
  0x16   : > { %s1285_s30 = smov (!%p218_p11, %s750_s30), 63 }
  0x17   : > { %s751_s6 = sshll.u32 %s1285_s30, 2  ;;  %s935_s30 = scalar_lea.vmem %s1213_s26, 4096 }
  0x18   : > { %s1106_s9 = scalar_lea.vmem %s1271_s0, %s751_s6  ;;  %818 = vmatpush3.bf16.msra.mxu0 %v425_v3  ;;  %856 = vmatpush3.bf16.msra.mxu1 %v425_v3  ;;  %p936_p12 = scmp.ne.s32.totalorder %s1213_s26, %s935_s30 }
  0x19   : > { %v919_v4 = vld [vmem:[%s1106_s9] sm:$0xff]   ;;  %v921_v6 = vld [vmem:[%s1106_s9 + $0x8] sm:$0xff]   ;;  %v923_v8 = vld [vmem:[%s1106_s9 + $0x10] sm:$0xff]   ;;  %s941_s6 = scalar_lea.vmem %s940_s5, 8192 }
  0x1a   : > { %v920_v5 = vld [vmem:[%s1106_s9 + $0x40] sm:$0xff]   ;;  %819 = vmatprep.mubr.msk.bf16.mxu0 %vm374_vm1, %v919_v4  ;;  %v922_v7 = vld [vmem:[%s1106_s9 + $0x48] sm:$0xff]   ;;  %v924_v9 = vld [vmem:[%s1106_s9 + $0x50] sm:$0xff]   ;;  %p937_p13 = pnand %p936_p12, %p1078_p4  ;;  %p943_p2 = scmp.lt.s32.totalorder %s941_s6, %s935_s30 }
  0x1b   : > { %835 = vmatprep.mubr.msk.bf16.mxu1 %vm374_vm1, %v920_v5  ;;  %820 = vmatmul.mubr.msk.bf16.vlgmr.msra.gmra.mrb[0].mxu0 %vm374_vm1, %v921_v6  ;;  %v925_v10 = vld [vmem:[%s1106_s9 + $0x18] sm:$0xff]   ;;  %v927_v12 = vld [vmem:[%s1106_s9 + $0x20] sm:$0xff]   ;;  %v929_v14 = vld [vmem:[%s1106_s9 + $0x28] sm:$0xff]  }
  0x1c   : > { %836 = vmatmul.mubr.msk.bf16.vlgmr.msra.gmra.mrb[0].mxu1 %vm374_vm1, %v922_v7  ;;  %823 = vmatprep.mubr.msk.bf16.mxu0 %vm374_vm1, %v923_v8  ;;  %v926_v11 = vld [vmem:[%s1106_s9 + $0x58] sm:$0xff]   ;;  %v928_v13 = vld [vmem:[%s1106_s9 + $0x60] sm:$0xff]   ;;  %v930_v15 = vld [vmem:[%s1106_s9 + $0x68] sm:$0xff]   ;;  %p938_p0 = pneg %p937_p13  ;;  %p944_p3 = por %p943_p2, %p942_p1 }
  0x1d   : > { %839 = vmatprep.mubr.msk.bf16.mxu1 %vm374_vm1, %v924_v9  ;;  %v931_v16 = vld [vmem:[%s1106_s9 + $0x30] sm:$0xff]   ;;  %v933_v18 = vld [vmem:[%s1106_s9 + $0x38] sm:$0xff]  }
  0x1e   : > { %v932_v17 = vld [vmem:[%s1106_s9 + $0x70] sm:$0xff]   ;;  %v934_v19 = vld [vmem:[%s1106_s9 + $0x78] sm:$0xff]   ;;  %p945_p5 = pnand %p944_p3, %p938_p0 }
  0x23   : > { %824 = vmatmul.mubr.msk.bf16.gmra.mrb[4].mxu0 %vm374_vm1, %v925_v10 }
  0x24   : > { %840 = vmatmul.mubr.msk.bf16.gmra.mrb[4].mxu1 %vm374_vm1, %v926_v11  ;;  %827 = vmatprep.mubr.msk.bf16.mxu0 %vm374_vm1, %v927_v12 }
  0x25   : > { %843 = vmatprep.mubr.msk.bf16.mxu1 %vm374_vm1, %v928_v13 }
  0x2b   : > { %828 = vmatmul.mubr.msk.bf16.gmra.mrb[8].mxu0 %vm374_vm1, %v929_v14 }
  0x2c   : > { %844 = vmatmul.mubr.msk.bf16.gmra.mrb[8].mxu1 %vm374_vm1, %v930_v15  ;;  %831 = vmatprep.mubr.msk.bf16.mxu0 %vm374_vm1, %v931_v16 }
  0x2d   : > { %847 = vmatprep.mubr.msk.bf16.mxu1 %vm374_vm1, %v932_v17 }
  0x33   : > { %832 = vmatmul.mubr.msk.bf16.gmra.mrb[12].mxu0 %vm374_vm1, %v933_v18 }
  0x34   : > { %848 = vmatmul.mubr.msk.bf16.gmra.mrb[12].mxu1 %vm374_vm1, %v934_v19 }
  0xee   : > { %v821_v21 = vpop.f32.mrb[0].mxu0 }
  0xef   : > { %v837_v22 = vpop.f32.mrb[0].mxu1  ;;  %v470_v23 = vadd.f32 %v821_v21, %v1146_v20  ;;  %v461_v25 = vpop.f32.mrb[1].mxu0 }
  0xf0   : > { %v534_v24 = vadd.f32 %v837_v22, %v1146_v20  ;;  %v525_v26 = vpop.f32.mrb[1].mxu1  ;;  %v462_v27 = vadd.f32 %v1146_v20, %v461_v25  ;;  %v822_v29 = vpop.f32.mrb[2].mxu0 }
  0xf1   : > { %v526_v28 = vadd.f32 %v1146_v20, %v525_v26  ;;  %v838_v30 = vpop.f32.mrb[2].mxu1  ;;  %590 = vst [vmem:[%s1152_s21 + $0x10] sm:$0xff] %v470_v23  ;;  %v473_v31 = vadd.f32 %v822_v29, %v1146_v20  ;;  %v464_v33 = vpop.f32.mrb[3].mxu0 }
  0xf2   : > { %606 = vst [vmem:[%s1152_s21 + $0x90] sm:$0xff] %v534_v24  ;;  %v537_v32 = vadd.f32 %v838_v30, %v1146_v20  ;;  %v528_v34 = vpop.f32.mrb[3].mxu1  ;;  %588 = vst [vmem:[%s1152_s21] sm:$0xff] %v462_v27  ;;  %v465_v35 = vadd.f32 %v1146_v20, %v464_v33 }
  0xf3   : > { %604 = vst [vmem:[%s1152_s21 + $0x80] sm:$0xff] %v526_v28  ;;  %v529_v36 = vadd.f32 %v1146_v20, %v528_v34  ;;  %591 = vst [vmem:[%s1152_s21 + $0x18] sm:$0xff] %v473_v31 }
  0xf4   : > { %607 = vst [vmem:[%s1152_s21 + $0x98] sm:$0xff] %v537_v32  ;;  %589 = vst [vmem:[%s1152_s21 + $0x8] sm:$0xff] %v465_v35 }
  0xf5   : > { %605 = vst [vmem:[%s1152_s21 + $0x88] sm:$0xff] %v529_v36 }
  0xf6   : > { %v825_v37 = vpop.f32.mrb[4].mxu0 }
  0xf7   : > { %v841_v38 = vpop.f32.mrb[4].mxu1  ;;  %v486_v39 = vadd.f32 %v825_v37, %v1146_v20  ;;  %v477_v41 = vpop.f32.mrb[5].mxu0 }
  0xf8   : > { %v550_v40 = vadd.f32 %v841_v38, %v1146_v20  ;;  %v541_v42 = vpop.f32.mrb[5].mxu1  ;;  %v478_v43 = vadd.f32 %v1146_v20, %v477_v41  ;;  %v826_v45 = vpop.f32.mrb[6].mxu0 }
  0xf9   : > { %v542_v44 = vadd.f32 %v1146_v20, %v541_v42  ;;  %v842_v46 = vpop.f32.mrb[6].mxu1  ;;  %594 = vst [vmem:[%s1152_s21 + $0x30] sm:$0xff] %v486_v39  ;;  %v489_v47 = vadd.f32 %v826_v45, %v1146_v20  ;;  %v480_v49 = vpop.f32.mrb[7].mxu0 }
  0xfa   : > { %610 = vst [vmem:[%s1152_s21 + $0xb0] sm:$0xff] %v550_v40  ;;  %v553_v48 = vadd.f32 %v842_v46, %v1146_v20  ;;  %v544_v50 = vpop.f32.mrb[7].mxu1  ;;  %592 = vst [vmem:[%s1152_s21 + $0x20] sm:$0xff] %v478_v43  ;;  %v481_v51 = vadd.f32 %v1146_v20, %v480_v49 }
  0xfb   : > { %608 = vst [vmem:[%s1152_s21 + $0xa0] sm:$0xff] %v542_v44  ;;  %v545_v52 = vadd.f32 %v1146_v20, %v544_v50  ;;  %595 = vst [vmem:[%s1152_s21 + $0x38] sm:$0xff] %v489_v47 }
  0xfc   : > { %611 = vst [vmem:[%s1152_s21 + $0xb8] sm:$0xff] %v553_v48  ;;  %593 = vst [vmem:[%s1152_s21 + $0x28] sm:$0xff] %v481_v51 }
  0xfd   : > { %609 = vst [vmem:[%s1152_s21 + $0xa8] sm:$0xff] %v545_v52 }
  0xfe   : > { %v829_v53 = vpop.f32.mrb[8].mxu0 }
  0xff   : > { %v845_v54 = vpop.f32.mrb[8].mxu1  ;;  %v502_v55 = vadd.f32 %v829_v53, %v1146_v20  ;;  %v493_v57 = vpop.f32.mrb[9].mxu0 }
 0x100   : > { %v566_v56 = vadd.f32 %v845_v54, %v1146_v20  ;;  %v557_v58 = vpop.f32.mrb[9].mxu1  ;;  %v494_v59 = vadd.f32 %v1146_v20, %v493_v57  ;;  %v830_v61 = vpop.f32.mrb[10].mxu0 }
 0x101   : > { %v558_v60 = vadd.f32 %v1146_v20, %v557_v58  ;;  %v846_v62 = vpop.f32.mrb[10].mxu1  ;;  %598 = vst [vmem:[%s1152_s21 + $0x50] sm:$0xff] %v502_v55  ;;  %v505_v63 = vadd.f32 %v830_v61, %v1146_v20  ;;  %v496_v1 = vpop.f32.mrb[11].mxu0 }
 0x102   : > { %614 = vst [vmem:[%s1152_s21 + $0xd0] sm:$0xff] %v566_v56  ;;  %v569_v0 = vadd.f32 %v846_v62, %v1146_v20  ;;  %v560_v2 = vpop.f32.mrb[11].mxu1  ;;  %596 = vst [vmem:[%s1152_s21 + $0x40] sm:$0xff] %v494_v59  ;;  %v497_v3 = vadd.f32 %v1146_v20, %v496_v1 }
 0x103   : > { %612 = vst [vmem:[%s1152_s21 + $0xc0] sm:$0xff] %v558_v60  ;;  %v561_v4 = vadd.f32 %v1146_v20, %v560_v2  ;;  %599 = vst [vmem:[%s1152_s21 + $0x58] sm:$0xff] %v505_v63 }
 0x104   : > { %615 = vst [vmem:[%s1152_s21 + $0xd8] sm:$0xff] %v569_v0  ;;  %597 = vst [vmem:[%s1152_s21 + $0x48] sm:$0xff] %v497_v3 }
 0x105   : > { %613 = vst [vmem:[%s1152_s21 + $0xc8] sm:$0xff] %v561_v4 }
 0x106   : > { %v833_v5 = vpop.f32.mrb[12].mxu0 }
 0x107   : > { %v849_v6 = vpop.f32.mrb[12].mxu1  ;;  %v518_v7 = vadd.f32 %v833_v5, %v1146_v20  ;;  %v509_v9 = vpop.f32.mrb[13].mxu0 }
 0x108   : > { %v582_v8 = vadd.f32 %v849_v6, %v1146_v20  ;;  %v573_v10 = vpop.f32.mrb[13].mxu1  ;;  %v510_v11 = vadd.f32 %v1146_v20, %v509_v9  ;;  %v834_v13 = vpop.f32.mrb[14].mxu0 }
 0x109   : > { %v574_v12 = vadd.f32 %v1146_v20, %v573_v10  ;;  %v850_v14 = vpop.f32.mrb[14].mxu1  ;;  %602 = vst [vmem:[%s1152_s21 + $0x70] sm:$0xff] %v518_v7  ;;  %v521_v15 = vadd.f32 %v834_v13, %v1146_v20  ;;  %v512_v17 = vpop.f32.mrb[15].mxu0 }
 0x10a   : > { %618 = vst [vmem:[%s1152_s21 + $0xf0] sm:$0xff] %v582_v8  ;;  %v585_v16 = vadd.f32 %v850_v14, %v1146_v20  ;;  %v576_v18 = vpop.f32.mrb[15].mxu1  ;;  %600 = vst [vmem:[%s1152_s21 + $0x60] sm:$0xff] %v510_v11  ;;  %v513_v19 = vadd.f32 %v1146_v20, %v512_v17 }
 0x10b   : > { %616 = vst [vmem:[%s1152_s21 + $0xe0] sm:$0xff] %v574_v12  ;;  %v577_v21 = vadd.f32 %v1146_v20, %v576_v18  ;;  %603 = vst [vmem:[%s1152_s21 + $0x78] sm:$0xff] %v521_v15 }
 0x10c   : > { %619 = vst [vmem:[%s1152_s21 + $0xf8] sm:$0xff] %v585_v16  ;;  %601 = vst [vmem:[%s1152_s21 + $0x68] sm:$0xff] %v513_v19 }
 0x10d   : > { %617 = vst [vmem:[%s1152_s21 + $0xe8] sm:$0xff] %v577_v21 }
 0x10e   : > { %948 = shalt.err (!%p945_p5)
}
 0x10f   : > { %s949_s7 = scalar_lea.hbm %s1211_s28, 4096  ;;  %s953_s10 = scalar_lea.hbm %s1274_s3, 8192 }
 0x110   : > { %p950_p6 = scmp.ne.s32.totalorder %s1211_s28, %s949_s7  ;;  %p954_p10 = scmp.lt.u32.totalorder %s1211_s28, %s1274_s3 }
 0x111   : > { %p955_p11 = scmp.lt.u32.totalorder %s953_s10, %s949_s7  ;;  %p957_p13 = scmp.lt.u32.totalorder %s949_s7, %s1211_s28 }
 0x112   : > { %p951_p7 = pnand %p950_p6, %p1078_p4 }
 0x113   : > { %p956_p12 = por %p955_p11, %p954_p10 }
 0x114   : > { %p952_p9 = pneg %p951_p7 }
 0x115   : > { %p958_p0 = por %p957_p13, %p956_p12 }
 0x117   : > { %p959_p1 = pnand %p958_p0, %p952_p9 }
 0x119   : > { %962 = shalt.err (!%p959_p1)
}
 0x11a   : > { %s1016_s19 = smov 128   ;;  %s1017_s21 = smov 8  }
 0x11b   : > { %859 = dma.vmem_to_hbm [thread:$0]  (%p1078_p4), %s1213_s26, 4096, %s1211_s28, %s1225_s29, %s1016_s19, %s1016_s19, %s1017_s21  }
 0x11c PF: > { %p865_p2 = scmp.ge.s32.totalorder %s1013_s17, 2  ;;  %s651_s23 = sand.u32 1, %s993_s12  }
 0x11d   : > { %s652_s15 = scalar_lea.sflag [#allocation3], %s651_s23 }
 0x11e   : > { %p862_p3 = pnand %p865_p2, %p1085_p8 }
 0x120   : > { %988 = dma.done.wait (!%p862_p3), %s652_s15, 4096  }
 0x121   : > { %990 = vsyncadd (!%p862_p3), %s652_s15, 4294963200  ;;  %s16_s17 = sadd.s32 1, %s1013_s17   ;;  %s1277_s12 = smov %s997_s13 }
 0x122   : > { %p13_p5 = scmp.ge.s32.totalorder %s16_s17, 4   ;;  %s1278_s13 = smov %s1001_s14 }
 0x123   : > { %s1279_s14 = smov %s1091_s25  ;;  %s1280_s15 = smov %s1009_s16 }
 0x124   : > { %s1281_s16 = smov %s1283_s20  ;;  %15 = sbr.rel (!%p13_p5) target bundleno = 4 (0x4), region = 73 }
 0x12b   :  { %657 = vsyncpa [#allocation3], 1 }
 0x12c   :  { %659 = vsyncpa [#allocation3 + $0x1], 1 }

</bundles_post_ra>
